<compile_context>
chip_gen: v6e
topology: v6e:2x2x1
jax: 0.10.0
libtpu: 0.0.40
codegen_flags: <defaults>
</compile_context>

<pallas_src>
import math

import jax
import jax.numpy as jnp
from jax.experimental import pallas as pl
from jax.experimental.pallas import tpu as pltpu


_LANE = 128            # lane width: pad feature dims (weights only) to this
_ROW_ALIGN = 16        # bf16 sublane packing: row tiles multiples of 16
_MIN_SPLIT_ROWS = 128  # don't shrink tiles below this just to add grid steps
_TARGET_GRID_STEPS = 4  # >= 2 grid steps per TensorCore on v7x megacore


def _round_up(x, m):
    return ((x + m - 1) // m) * m


def _decoder_kernel(x_ref,
                    w0_ref, b0_ref,
                    w1_ref, b1_ref,
                    w2_ref, b2_ref,
                    w3_ref, b3_ref,
                    o_ref,
                    xpad_ref):
    in_f = x_ref.shape[1]
    in_p = xpad_ref.shape[1]
    out_f = o_ref.shape[1]

    # Lane-pad + cast x inside VMEM (never materialised in HBM).  Padded
    # lanes are zero and hit zero weight rows, so the result is exact.
    if in_p > in_f:
        xpad_ref[...] = jnp.zeros_like(xpad_ref)
    xpad_ref[:, :in_f] = x_ref[...].astype(jnp.bfloat16)
    x = xpad_ref[...]                                            # (tm, in_p) bf16

    # fc_in + ReLU   (bf16 MXU operands, f32 accumulate / elementwise)
    h = jnp.dot(x, w0_ref[...], preferred_element_type=jnp.float32) + b0_ref[...]
    h = jnp.maximum(h, 0.0)
    # fc_h0 + ReLU
    h = jnp.dot(h.astype(jnp.bfloat16), w1_ref[...],
                preferred_element_type=jnp.float32) + b1_ref[...]
    h = jnp.maximum(h, 0.0)
    # fc_h1 + ReLU
    h = jnp.dot(h.astype(jnp.bfloat16), w2_ref[...],
                preferred_element_type=jnp.float32) + b2_ref[...]
    h = jnp.maximum(h, 0.0)
    # fc_out
    y = jnp.dot(h.astype(jnp.bfloat16), w3_ref[...],
                preferred_element_type=jnp.float32) + b3_ref[...]

    # Only the real out_f lanes leave VMEM (native-width f32 writeback).
    o_ref[...] = y[:, :out_f].astype(o_ref.dtype)


def prepare_params(params):
    """Pad + cast the weights/biases ONCE (outside the forward path).

    Weights are (in_dim, out_dim), i.e. transposed relative to torch's
    (out, in), so the kernel computes y = x @ W + b.  Feature dims are
    zero-padded to multiples of 128; zero rows/cols/bias lanes are exact."""
    w0, b0, w1, b1, w2, b2, w3, b3 = params
    in_f, hid = w0.shape
    out_f = w3.shape[1]
    in_p = _round_up(in_f, _LANE)
    hid_p = _round_up(hid, _LANE)
    out_p = _round_up(out_f, _LANE)

    def padw(w, rows, cols):
        return jnp.pad(w, ((0, rows - w.shape[0]),
                           (0, cols - w.shape[1]))).astype(jnp.bfloat16)

    def padb(b, cols):
        b = b.reshape(1, -1)
        return jnp.pad(b, ((0, 0), (0, cols - b.shape[1]))).astype(jnp.float32)

    return (padw(w0, in_p, hid_p), padb(b0, hid_p),
            padw(w1, hid_p, hid_p), padb(b1, hid_p),
            padw(w2, hid_p, hid_p), padb(b2, hid_p),
            padw(w3, hid_p, out_p), padb(b3, out_p))


def decoder_forward(x_in, prepared, out_features, *, tm=1024):
    """x_in: (..., in_features) float32.  `prepared` = prepare_params(params).
    Returns (..., out_features) float32."""
    w0p, b0p, w1p, b1p, w2p, b2p, w3p, b3p = prepared
    in_f = x_in.shape[-1]
    in_p, hid_p = w0p.shape
    out_p = w3p.shape[1]
    out_f = out_features
    assert in_p == _round_up(in_f, _LANE)

    lead = x_in.shape[:-1]
    M = int(math.prod(lead))

    # ---- row tiling ---------------------------------------------------------
    M_align = _round_up(max(M, 1), _ROW_ALIGN)
    tm_eff = max(_ROW_ALIGN, min(_round_up(tm, _ROW_ALIGN), M_align))
    # v7x megacore: aim for >= 2 grid steps per TensorCore when the split
    # still leaves reasonably sized tiles (keeps DMA/compute overlap on both
    # cores instead of one exposed step per core).
    if (M_align // tm_eff < _TARGET_GRID_STEPS
            and M_align >= _TARGET_GRID_STEPS * _MIN_SPLIT_ROWS):
        tm_eff = max(_ROW_ALIGN,
                     _round_up(pl.cdiv(M_align, _TARGET_GRID_STEPS), _ROW_ALIGN))
    M_pad = _round_up(M, tm_eff)
    grid = M_pad // tm_eff

    x2d = x_in.reshape(M, in_f)
    if M_pad > M:
        # Row-only padding (no lane inflation, no dtype cast).
        x2d = jnp.pad(x2d, ((0, M_pad - M), (0, 0)))

    const = lambda r, c: pl.BlockSpec((r, c), lambda i: (0, 0))

    # TODO(synk): if hidden_features is scaled toward ~2K+, add a K/N grid
    # axis ('arbitrary') with a VMEM f32 accumulator instead of keeping all
    # four full weights resident, and single-buffer the grid-invariant
    # weight specs (pipeline_mode=pl.Buffered(1)) to stay inside v7x's 64 MiB.
    out = pl.pallas_call(
        _decoder_kernel,
        out_shape=jax.ShapeDtypeStruct((M_pad, out_f), jnp.float32),
        grid_spec=pltpu.PrefetchScalarGridSpec(
            num_scalar_prefetch=0,
            grid=(grid,),
            in_specs=[
                pl.BlockSpec((tm_eff, in_f), lambda i: (i, 0)),   # x, native width
                const(in_p, hid_p), const(1, hid_p),              # fc_in
                const(hid_p, hid_p), const(1, hid_p),             # fc_h0
                const(hid_p, hid_p), const(1, hid_p),             # fc_h1
                const(hid_p, out_p), const(1, out_p),             # fc_out
            ],
            out_specs=pl.BlockSpec((tm_eff, out_f), lambda i: (i, 0)),
            scratch_shapes=[pltpu.VMEM((tm_eff, in_p), jnp.bfloat16)],
        ),
        compiler_params=pltpu.CompilerParams(
            dimension_semantics=("parallel",),
            vmem_limit_bytes=32 * 1024 * 1024,
        ),
    )(x2d, w0p, b0p, w1p, b1p, w2p, b2p, w3p, b3p)

    return out[:M, :].reshape(*lead, out_f)


def init_params(key, in_features, hidden_features, out_features):
    """Deterministic synthetic parameters (torch.nn.Linear-like scale)."""
    ks = jax.random.split(key, 8)

    def lin(kw, kb, fan_in, fan_out):
        lim = 1.0 / jnp.sqrt(jnp.float32(fan_in))
        w = jax.random.uniform(kw, (fan_in, fan_out), jnp.float32, -lim, lim)
        b = jax.random.uniform(kb, (1, fan_out), jnp.float32, -lim, lim)
        return w, b

    w0, b0 = lin(ks[0], ks[1], in_features, hidden_features)
    w1, b1 = lin(ks[2], ks[3], hidden_features, hidden_features)
    w2, b2 = lin(ks[4], ks[5], hidden_features, hidden_features)
    w3, b3 = lin(ks[6], ks[7], hidden_features, out_features)
    return (w0, b0, w1, b1, w2, b2, w3, b3)


def _reference_forward(x_in, params):
    """Pure-JAX reference of the PyTorch Decoder forward.

    Uses the same bf16-operand / f32-accumulate matmul convention as the
    kernel so the comparison isolates kernel correctness from dtype choice."""
    w0, b0, w1, b1, w2, b2, w3, b3 = params
    x = x_in.reshape(-1, x_in.shape[-1])

    def lin(a, w, b):
        return jnp.dot(a.astype(jnp.bfloat16), w.astype(jnp.bfloat16),
                       preferred_element_type=jnp.float32) + b

    x = jnp.maximum(lin(x, w0, b0), 0.0)
    x = jnp.maximum(lin(x, w1, b1), 0.0)
    x = jnp.maximum(lin(x, w2, b2), 0.0)
    x = lin(x, w3, b3)
    return x.reshape(*x_in.shape[:-1], -1)


if __name__ == "__main__":
    # Small shapes consistent with the module: x is (B, N, in_features)
    B, N = 2, 8
    in_features, hidden_features, out_features = 16, 32, 16

    key = jax.random.PRNGKey(0)
    k_x, k_p = jax.random.split(key)
    x_in = jax.random.normal(k_x, (B, N, in_features), jnp.float32)
    params = init_params(k_p, in_features, hidden_features, out_features)

    prepared = prepare_params(params)            # one-time pad/cast of weights
    out = decoder_forward(x_in, prepared, out_features)
    out = jax.block_until_ready(out)

    ref = _reference_forward(x_in, params)
    assert out.shape == (B, N, out_features)
    assert jnp.allclose(out, ref, atol=2e-3, rtol=2e-3)

    print("KERNEL_OK")
</pallas_src>

<mosaic_0001>
module attributes {stable_mosaic.version = 11 : i64} {
  func.func @_decoder_kernel(%arg0: i32, %arg1: memref<16x16xf32, #tpu.memory_space<vmem>>, %arg2: memref<128x128xbf16, #tpu.memory_space<vmem>>, %arg3: memref<1x128xf32, #tpu.memory_space<vmem>>, %arg4: memref<128x128xbf16, #tpu.memory_space<vmem>>, %arg5: memref<1x128xf32, #tpu.memory_space<vmem>>, %arg6: memref<128x128xbf16, #tpu.memory_space<vmem>>, %arg7: memref<1x128xf32, #tpu.memory_space<vmem>>, %arg8: memref<128x128xbf16, #tpu.memory_space<vmem>>, %arg9: memref<1x128xf32, #tpu.memory_space<vmem>>, %arg10: memref<16x16xf32, #tpu.memory_space<vmem>>, %arg11: memref<16x128xbf16, #tpu.memory_space<vmem>>) attributes {dimension_semantics = [#tpu.dimension_semantics<parallel>], iteration_bounds = array<i64: 1>, scalar_prefetch = 0 : i64, scratch_operands = 1 : i64, tpu.core_type = #tpu.core_type<tc>, window_params = [{transform_indices = @transform_0, window_bounds = array<i64: 16, 16>}, {pipeline_mode = #tpu.pipeline_mode<synchronous>, transform_indices = @transform_1, window_bounds = array<i64: 128, 128>}, {pipeline_mode = #tpu.pipeline_mode<synchronous>, transform_indices = @transform_2, window_bounds = array<i64: 1, 128>}, {pipeline_mode = #tpu.pipeline_mode<synchronous>, transform_indices = @transform_3, window_bounds = array<i64: 128, 128>}, {pipeline_mode = #tpu.pipeline_mode<synchronous>, transform_indices = @transform_4, window_bounds = array<i64: 1, 128>}, {pipeline_mode = #tpu.pipeline_mode<synchronous>, transform_indices = @transform_5, window_bounds = array<i64: 128, 128>}, {pipeline_mode = #tpu.pipeline_mode<synchronous>, transform_indices = @transform_6, window_bounds = array<i64: 1, 128>}, {pipeline_mode = #tpu.pipeline_mode<synchronous>, transform_indices = @transform_7, window_bounds = array<i64: 128, 128>}, {pipeline_mode = #tpu.pipeline_mode<synchronous>, transform_indices = @transform_8, window_bounds = array<i64: 1, 128>}, {transform_indices = @transform_9, window_bounds = array<i64: 16, 16>}]} {
    %cst = arith.constant 0.000000e+00 : bf16
    %0 = vector.broadcast %cst : bf16 to vector<16x128xbf16>
    %c0 = arith.constant 0 : index
    %c0_0 = arith.constant 0 : index
    %1 = vector.load %arg11[%c0, %c0_0] : memref<16x128xbf16, #tpu.memory_space<vmem>>, vector<16x128xbf16>
    tpu.vector_store %arg11[%c0, %c0_0], %0 {strides = array<i32>} : memref<16x128xbf16, #tpu.memory_space<vmem>>, vector<16x128xbf16>,
    %c0_1 = arith.constant 0 : index
    %c0_2 = arith.constant 0 : index
    %2 = vector.load %arg1[%c0_1, %c0_2] : memref<16x16xf32, #tpu.memory_space<vmem>>, vector<16x16xf32>
    %3 = arith.truncf %2 : vector<16x16xf32> to vector<16x16xbf16>
    %c0_3 = arith.constant 0 : index
    %c0_4 = arith.constant 0 : index
    %4 = vector.load %arg11[%c0_3, %c0_4] : memref<16x128xbf16, #tpu.memory_space<vmem>>, vector<16x16xbf16>
    tpu.vector_store %arg11[%c0_3, %c0_4], %3 {strides = array<i32>} : memref<16x128xbf16, #tpu.memory_space<vmem>>, vector<16x16xbf16>,
    %c0_5 = arith.constant 0 : index
    %c0_6 = arith.constant 0 : index
    %5 = vector.load %arg11[%c0_5, %c0_6] : memref<16x128xbf16, #tpu.memory_space<vmem>>, vector<16x128xbf16>
    %c0_7 = arith.constant 0 : index
    %c0_8 = arith.constant 0 : index
    %6 = vector.load %arg2[%c0_7, %c0_8] : memref<128x128xbf16, #tpu.memory_space<vmem>>, vector<128x128xbf16>
    %cst_9 = arith.constant dense<0.000000e+00> : vector<16x128xf32>
    %7 = tpu.matmul %5, %6, %cst_9 {dimension_numbers = #tpu.dot_dimension_numbers<[1], [0], [0], [1], [0, 0, 1, 1], [], []>} : vector<16x128xbf16>, vector<128x128xbf16>, vector<16x128xf32> -> vector<16x128xf32>
    %c0_10 = arith.constant 0 : index
    %c0_11 = arith.constant 0 : index
    %8 = vector.load %arg3[%c0_10, %c0_11] : memref<1x128xf32, #tpu.memory_space<vmem>>, vector<1x128xf32>
    %9 = vector.broadcast %8 : vector<1x128xf32> to vector<16x128xf32>
    %10 = arith.addf %7, %9 : vector<16x128xf32>
    %cst_12 = arith.constant 0.000000e+00 : f32
    %11 = vector.broadcast %cst_12 : f32 to vector<16x128xf32>
    %12 = arith.maximumf %10, %11 : vector<16x128xf32>
    %13 = arith.truncf %12 : vector<16x128xf32> to vector<16x128xbf16>
    %c0_13 = arith.constant 0 : index
    %c0_14 = arith.constant 0 : index
    %14 = vector.load %arg4[%c0_13, %c0_14] : memref<128x128xbf16, #tpu.memory_space<vmem>>, vector<128x128xbf16>
    %cst_15 = arith.constant dense<0.000000e+00> : vector<16x128xf32>
    %15 = tpu.matmul %13, %14, %cst_15 {dimension_numbers = #tpu.dot_dimension_numbers<[1], [0], [0], [1], [0, 0, 1, 1], [], []>} : vector<16x128xbf16>, vector<128x128xbf16>, vector<16x128xf32> -> vector<16x128xf32>
    %c0_16 = arith.constant 0 : index
    %c0_17 = arith.constant 0 : index
    %16 = vector.load %arg5[%c0_16, %c0_17] : memref<1x128xf32, #tpu.memory_space<vmem>>, vector<1x128xf32>
    %17 = vector.broadcast %16 : vector<1x128xf32> to vector<16x128xf32>
    %18 = arith.addf %15, %17 : vector<16x128xf32>
    %cst_18 = arith.constant 0.000000e+00 : f32
    %19 = vector.broadcast %cst_18 : f32 to vector<16x128xf32>
    %20 = arith.maximumf %18, %19 : vector<16x128xf32>
    %21 = arith.truncf %20 : vector<16x128xf32> to vector<16x128xbf16>
    %c0_19 = arith.constant 0 : index
    %c0_20 = arith.constant 0 : index
    %22 = vector.load %arg6[%c0_19, %c0_20] : memref<128x128xbf16, #tpu.memory_space<vmem>>, vector<128x128xbf16>
    %cst_21 = arith.constant dense<0.000000e+00> : vector<16x128xf32>
    %23 = tpu.matmul %21, %22, %cst_21 {dimension_numbers = #tpu.dot_dimension_numbers<[1], [0], [0], [1], [0, 0, 1, 1], [], []>} : vector<16x128xbf16>, vector<128x128xbf16>, vector<16x128xf32> -> vector<16x128xf32>
    %c0_22 = arith.constant 0 : index
    %c0_23 = arith.constant 0 : index
    %24 = vector.load %arg7[%c0_22, %c0_23] : memref<1x128xf32, #tpu.memory_space<vmem>>, vector<1x128xf32>
    %25 = vector.broadcast %24 : vector<1x128xf32> to vector<16x128xf32>
    %26 = arith.addf %23, %25 : vector<16x128xf32>
    %cst_24 = arith.constant 0.000000e+00 : f32
    %27 = vector.broadcast %cst_24 : f32 to vector<16x128xf32>
    %28 = arith.maximumf %26, %27 : vector<16x128xf32>
    %29 = arith.truncf %28 : vector<16x128xf32> to vector<16x128xbf16>
    %c0_25 = arith.constant 0 : index
    %c0_26 = arith.constant 0 : index
    %30 = vector.load %arg8[%c0_25, %c0_26] : memref<128x128xbf16, #tpu.memory_space<vmem>>, vector<128x128xbf16>
    %cst_27 = arith.constant dense<0.000000e+00> : vector<16x128xf32>
    %31 = tpu.matmul %29, %30, %cst_27 {dimension_numbers = #tpu.dot_dimension_numbers<[1], [0], [0], [1], [0, 0, 1, 1], [], []>} : vector<16x128xbf16>, vector<128x128xbf16>, vector<16x128xf32> -> vector<16x128xf32>
    %c0_28 = arith.constant 0 : index
    %c0_29 = arith.constant 0 : index
    %32 = vector.load %arg9[%c0_28, %c0_29] : memref<1x128xf32, #tpu.memory_space<vmem>>, vector<1x128xf32>
    %33 = vector.broadcast %32 : vector<1x128xf32> to vector<16x128xf32>
    %34 = arith.addf %31, %33 : vector<16x128xf32>
    %35 = vector.extract_strided_slice %34 {offsets = [0, 0], sizes = [16, 16], strides = [1, 1]} : vector<16x128xf32> to vector<16x16xf32>
    %c0_30 = arith.constant 0 : index
    %c0_31 = arith.constant 0 : index
    %36 = vector.load %arg10[%c0_30, %c0_31] : memref<16x16xf32, #tpu.memory_space<vmem>>, vector<16x16xf32>
    tpu.vector_store %arg10[%c0_30, %c0_31], %35 {strides = array<i32>} : memref<16x16xf32, #tpu.memory_space<vmem>>, vector<16x16xf32>,
    return
  }
  func.func @transform_0(%arg0: i32) -> (i32, i32) {
    %c0_i32 = arith.constant 0 : i32
    %c0_i32_0 = arith.constant 0 : i32
    return %arg0, %c0_i32 : i32, i32
  }
  func.func @transform_1(%arg0: i32) -> (i32, i32) {
    %c0_i32 = arith.constant 0 : i32
    %c0_i32_0 = arith.constant 0 : i32
    %c0_i32_1 = arith.constant 0 : i32
    return %c0_i32, %c0_i32_0 : i32, i32
  }
  func.func @transform_2(%arg0: i32) -> (i32, i32) {
    %c0_i32 = arith.constant 0 : i32
    %c0_i32_0 = arith.constant 0 : i32
    %c0_i32_1 = arith.constant 0 : i32
    return %c0_i32, %c0_i32_0 : i32, i32
  }
  func.func @transform_3(%arg0: i32) -> (i32, i32) {
    %c0_i32 = arith.constant 0 : i32
    %c0_i32_0 = arith.constant 0 : i32
    %c0_i32_1 = arith.constant 0 : i32
    return %c0_i32, %c0_i32_0 : i32, i32
  }
  func.func @transform_4(%arg0: i32) -> (i32, i32) {
    %c0_i32 = arith.constant 0 : i32
    %c0_i32_0 = arith.constant 0 : i32
    %c0_i32_1 = arith.constant 0 : i32
    return %c0_i32, %c0_i32_0 : i32, i32
  }
  func.func @transform_5(%arg0: i32) -> (i32, i32) {
    %c0_i32 = arith.constant 0 : i32
    %c0_i32_0 = arith.constant 0 : i32
    %c0_i32_1 = arith.constant 0 : i32
    return %c0_i32, %c0_i32_0 : i32, i32
  }
  func.func @transform_6(%arg0: i32) -> (i32, i32) {
    %c0_i32 = arith.constant 0 : i32
    %c0_i32_0 = arith.constant 0 : i32
    %c0_i32_1 = arith.constant 0 : i32
    return %c0_i32, %c0_i32_0 : i32, i32
  }
  func.func @transform_7(%arg0: i32) -> (i32, i32) {
    %c0_i32 = arith.constant 0 : i32
    %c0_i32_0 = arith.constant 0 : i32
    %c0_i32_1 = arith.constant 0 : i32
    return %c0_i32, %c0_i32_0 : i32, i32
  }
  func.func @transform_8(%arg0: i32) -> (i32, i32) {
    %c0_i32 = arith.constant 0 : i32
    %c0_i32_0 = arith.constant 0 : i32
    %c0_i32_1 = arith.constant 0 : i32
    return %c0_i32, %c0_i32_0 : i32, i32
  }
  func.func @transform_9(%arg0: i32) -> (i32, i32) {
    %c0_i32 = arith.constant 0 : i32
    %c0_i32_0 = arith.constant 0 : i32
    return %arg0, %c0_i32 : i32, i32
  }
}

</mosaic_0001>

<bundles_post_ra>
// kernel: tpu_custom_call.1
= control target key start
LH: loop header
LB: loop body
LE: loop exit
PB: predicated region body
PF: predicated region fallthrough
CT: control target
= control target key end

     0   :  { %14 = vsyncpa [#allocation4], 0  ;;  %s1086_s0 = inlined_call_operand.hbm [shape: f32[16,16], index: 0, kind: input, shape index: {}]   ;;  %s1087_s1 = inlined_call_operand.hbm [shape: bf16[128,128], index: 1, kind: input, shape index: {}]   ;;  %s1088_s2 = inlined_call_operand.vmem [shape: f32[1,128], index: 2, kind: input, shape index: {}]   ;;  %s1089_s3 = inlined_call_operand.hbm [shape: bf16[128,128], index: 3, kind: input, shape index: {}]   ;;  %s1090_s4 = inlined_call_operand.vmem [shape: f32[1,128], index: 4, kind: input, shape index: {}]   ;;  %s1091_s5 = inlined_call_operand.hbm [shape: bf16[128,128], index: 5, kind: input, shape index: {}]   ;;  %s1092_s6 = inlined_call_operand.vmem [shape: f32[1,128], index: 6, kind: input, shape index: {}]   ;;  %s1093_s7 = inlined_call_operand.hbm [shape: bf16[128,128], index: 7, kind: input, shape index: {}]   ;;  %s1094_s8 = inlined_call_operand.vmem [shape: f32[1,128], index: 8, kind: input, shape index: {}]   ;;  %s1095_s9 = inlined_call_operand.hbm [shape: f32[16,16], index: 9, kind: output, shape index: {}]  }
   0x1   :  { %15 = vsyncpa [#allocation7], 0 }
   0x2   :  { %16 = vsyncpa [#allocation10], 0 }
   0x3   :  { %17 = vsyncpa [#allocation5], 0  ;;  %s935_s30 = smov [#allocation6]  }
   0x4   :  { %s35_s10 = sshll.u32 %s935_s30, 4  ;;  %s36_s10 = int_to_ptr.vmem [resolvable:$true] %s35_s10 }
   0x5   :  { %s815_s11 = scalar_lea.vmem %s36_s10, 1024  ;;  %p820_p1 = scmp.lt.s32.totalorder %s36_s10, %s36_s10 }
   0x6   :  { %p816_p0 = scmp.ne.s32.totalorder %s36_s10, %s815_s11  ;;  %p821_p2 = scmp.lt.s32.totalorder %s815_s11, %s815_s11 }
   0x8   :  { %p822_p3 = por %p821_p2, %p820_p1 }
   0xa   :  { %p823_p4 = pnand %p822_p3, %p816_p0 }
   0xc   :  { %826 = shalt.err (!%p823_p4)
}
   0xd   :  { %s936_s12 = smov 64   ;;  %s937_s13 = smov 4  }
   0xe   :  { %41 = dma.hbm_to_vmem [thread:$0]  %s1087_s1, 1024, %s36_s10, [#allocation7], %s936_s12, %s936_s12, %s937_s13  }
   0xf   :  { %s938_s16 = smov [#allocation9]   ;;  %s939_s18 = smov [#allocation3]  }
  0x10   :  { %s63_s17 = sshll.u32 %s938_s16, 4  ;;  %s23_s19 = sshll.u32 %s939_s18, 4  ;;  %s64_s17 = int_to_ptr.vmem [resolvable:$true] %s63_s17  ;;  %s24_s19 = int_to_ptr.vmem [resolvable:$true] %s23_s19 }
  0x11   :  { %s835_s20 = scalar_lea.vmem %s64_s17, 1024  ;;  %p840_p6 = scmp.lt.s32.totalorder %s64_s17, %s64_s17 }
  0x12   :  { %p836_p5 = scmp.ne.s32.totalorder %s64_s17, %s835_s20  ;;  %p841_p7 = scmp.lt.s32.totalorder %s835_s20, %s835_s20 }
  0x14   :  { %p842_p8 = por %p841_p7, %p840_p6 }
  0x16   :  { %p843_p9 = pnand %p842_p8, %p836_p5 }
  0x18   :  { %846 = shalt.err (!%p843_p9)
}
  0x19   :  { %69 = dma.hbm_to_vmem [thread:$0]  %s1091_s5, 1024, %s64_s17, [#allocation10], %s936_s12, %s936_s12, %s937_s13  }
  0x1a   :  { %s855_s1 = scalar_lea.vmem %s24_s19, 256  ;;  %p860_p11 = scmp.lt.s32.totalorder %s24_s19, %s24_s19 }
  0x1b   :  { %p856_p10 = scmp.ne.s32.totalorder %s24_s19, %s855_s1  ;;  %p861_p12 = scmp.lt.s32.totalorder %s855_s1, %s855_s1 }
  0x1d   :  { %p862_p13 = por %p861_p12, %p860_p11 }
  0x1f   :  { %p863_p0 = pnand %p862_p13, %p856_p10 }
  0x21   :  { %866 = shalt.err (!%p863_p0)
}
  0x22   :  { %s940_s23 = smov 128   ;;  %s941_s24 = smov 8  }
  0x23   :  { %29 = dma.hbm_to_vmem [thread:$0]  %s1086_s0, 256, %s24_s19, [#allocation4], %s940_s23, %s940_s23, %s941_s24  }
  0x24   :  { %s942_s27 = smov [#allocation8]   ;;  %s943_s5 = smov [#allocation11]  }
  0x25   :  { %s49_s28 = sshll.u32 %s942_s27, 4  ;;  %s77_s29 = sshll.u32 %s943_s5, 4  ;;  %s50_s28 = int_to_ptr.vmem [resolvable:$true] %s49_s28  ;;  %s78_s29 = int_to_ptr.vmem [resolvable:$true] %s77_s29 }
  0x26   :  { %s875_s30 = scalar_lea.vmem %s50_s28, 1024  ;;  %p880_p2 = scmp.lt.s32.totalorder %s50_s28, %s50_s28 }
  0x27   :  { %p876_p1 = scmp.ne.s32.totalorder %s50_s28, %s875_s30  ;;  %p881_p3 = scmp.lt.s32.totalorder %s875_s30, %s875_s30 }
  0x29   :  { %p882_p4 = por %p881_p3, %p880_p2 }
  0x2b   :  { %p883_p5 = pnand %p882_p4, %p876_p1 }
  0x2d   :  { %886 = shalt.err (!%p883_p5)
}
  0x2e   :  { %55 = dma.hbm_to_vmem [thread:$0]  %s1089_s3, 1024, %s50_s28, [#allocation7], %s936_s12, %s936_s12, %s937_s13  }
  0x2f   :  { %s895_s0 = scalar_lea.vmem %s78_s29, 1024  ;;  %p900_p7 = scmp.lt.s32.totalorder %s78_s29, %s78_s29 }
  0x30   :  { %p896_p6 = scmp.ne.s32.totalorder %s78_s29, %s895_s0  ;;  %p901_p8 = scmp.lt.s32.totalorder %s895_s0, %s895_s0 }
  0x32   :  { %p902_p9 = por %p901_p8, %p900_p7 }
  0x34   :  { %p903_p10 = pnand %p902_p9, %p896_p6 }
  0x36   :  { %906 = shalt.err (!%p903_p10)
}
  0x37   :  { %83 = dma.hbm_to_vmem [thread:$0]  %s1093_s7, 1024, %s78_s29, [#allocation10], %s936_s12, %s936_s12, %s937_s13  }
  0x38   :  { %927 = dma.done.wait [#allocation4], 256  }
  0x39   :  { %928 = vsyncadd [#allocation4], 4294967040 }
  0x3a   :  { %929 = dma.done.wait [#allocation7], 2048  }
  0x3b   :  { %930 = vsyncadd [#allocation7], 4294965248 }
  0x3c   :  { %931 = dma.done.wait [#allocation10], 2048  }
  0x3d   :  { %932 = vsyncadd [#allocation10], 4294965248  ;;  %v944_v0 = vmov 0.0   ;;  %vm945_vm0 = vmmov 0   ;;  %v946_v1 = vmov 0   ;;  %v774_v2 = vld [vmem:[#allocation6 + $0x38] sm:$0xff]  }
  0x3e   :  { %681 = vmatprep.subr.bf16.mxu0 %v944_v0  ;;  %697 = vmatprep.mubr.msk.bf16.mxu0 %vm945_vm0, %v944_v0  ;;  %102 = vst [vmem:[#allocation2] sm:$0xf] %v946_v1  ;;  %103 = vst [vmem:[#allocation2 + $0x4] sm:$0xf] %v946_v1  ;;  %v775_v3 = vld [vmem:[#allocation6 + $0x30] sm:$0xff]   ;;  %v776_v4 = vld [vmem:[#allocation6 + $0x28] sm:$0xff]  }
  0x3f   :  { %701 = vmatprep.subr.bf16.mxu1 %v944_v0  ;;  %717 = vmatprep.mubr.msk.bf16.mxu1 %vm945_vm0, %v944_v0  ;;  %v104_v5 = vld [vmem:[#allocation3] sm:$0xff]  ;;  %v105_v6 = vld [vmem:[#allocation3 + $0x8] sm:$0xff]  ;;  %vm114_vm1 = vcmask 125952   ;;  %v777_v10 = vld [vmem:[#allocation6 + $0x20] sm:$0xff]   ;;  %vm582_vm2 = vcmask 130048   ;;  %s947_s18 = smov [#allocation12]  }
  0x40   :  { %682 = vmatpush3.bf16.msra.mxu0 %v774_v2  ;;  %v643_v7 = vpack.c.bf16 %v104_v5, %v104_v5  ;;  %v644_v8 = vpack.c.bf16 %v105_v6, %v105_v6  ;;  %v783_v9 = vld [vmem:[#allocation8 + $0x38] sm:$0xff]   ;;  %v784_v11 = vld [vmem:[#allocation8 + $0x30] sm:$0xff]   ;;  %v785_v13 = vld [vmem:[#allocation8 + $0x28] sm:$0xff]  }
  0x41   :  { %683 = vmatprep.subr.bf16.mxu0 %v944_v0  ;;  %702 = vmatpush3.bf16.msra.mxu1 %v783_v9  ;;  %v778_v12 = vld [vmem:[#allocation6 + $0x18] sm:$0xff]   ;;  %v779_v14 = vld [vmem:[#allocation6 + $0x10] sm:$0xff]   ;;  %v786_v15 = vld [vmem:[#allocation8 + $0x20] sm:$0xff]  }
  0x42   :  { %115 = vst.msk [vmem:[#allocation2] sm:$0xf] %vm114_vm1, %v643_v7  ;;  %116 = vst.msk [vmem:[#allocation2 + $0x4] sm:$0xf] %vm114_vm1, %v644_v8  ;;  %703 = vmatprep.subr.bf16.mxu1 %v944_v0  ;;  %v780_v16 = vld [vmem:[#allocation6 + $0x8] sm:$0xff]   ;;  %v787_v17 = vld [vmem:[#allocation8 + $0x18] sm:$0xff]  }
  0x43   :  { %v781_v18 = vld [vmem:[#allocation6] sm:$0xff]   ;;  %v788_v20 = vld [vmem:[#allocation8 + $0x10] sm:$0xff]   ;;  %v789_v21 = vld [vmem:[#allocation8 + $0x8] sm:$0xff]  }
  0x44   :  { %684 = vmatpush3.bf16.msra.mxu0 %v775_v3  ;;  %v790_v22 = vld [vmem:[#allocation8] sm:$0xff]   ;;  %v791_v23 = vld [vmem:[#allocation9 + $0x38] sm:$0xff]   ;;  %v792_v24 = vld [vmem:[#allocation9 + $0x30] sm:$0xff]  }
  0x45   :  { %685 = vmatprep.subr.bf16.mxu0 %v944_v0  ;;  %704 = vmatpush3.bf16.msra.mxu1 %v784_v11  ;;  %v793_v25 = vld [vmem:[#allocation9 + $0x28] sm:$0xff]   ;;  %v794_v26 = vld [vmem:[#allocation9 + $0x20] sm:$0xff]   ;;  %v795_v27 = vld [vmem:[#allocation9 + $0x18] sm:$0xff]  }
  0x46   :  { %705 = vmatprep.subr.bf16.mxu1 %v944_v0  ;;  %v606_v28 = vld [vmem:[%s1088_s2] ss:$0 sm:$0xff]  ;;  %v796_v38 = vld [vmem:[#allocation9 + $0x10] sm:$0xff]   ;;  %v798_v40 = vld [vmem:[#allocation9] sm:$0xff]  }
  0x47   :  { %v797_v39 = vld [vmem:[#allocation9 + $0x8] sm:$0xff]   ;;  %v799_v41 = vld [vmem:[#allocation11 + $0x38] sm:$0xff]   ;;  %v800_v42 = vld [vmem:[#allocation11 + $0x30] sm:$0xff]  }
  0x48   :  { %686 = vmatpush3.bf16.msra.mxu0 %v776_v4  ;;  %v801_v43 = vld [vmem:[#allocation11 + $0x28] sm:$0xff]   ;;  %v802_v44 = vld [vmem:[#allocation11 + $0x20] sm:$0xff]   ;;  %v803_v45 = vld [vmem:[#allocation11 + $0x18] sm:$0xff]  }
  0x49   :  { %687 = vmatprep.subr.bf16.mxu0 %v944_v0  ;;  %706 = vmatpush3.bf16.msra.mxu1 %v785_v13  ;;  %v782_v19 = vld [vmem:[#allocation2] sm:$0xff]   ;;  %v804_v56 = vld [vmem:[#allocation11 + $0x10] sm:$0xff]   ;;  %v806_v58 = vld [vmem:[#allocation11] sm:$0xff]  }
  0x4a   :  { %707 = vmatprep.subr.bf16.mxu1 %v944_v0  ;;  %v616_v46 = vld [vmem:[%s1090_s4] ss:$0 sm:$0xff] }
  0x4b   :  { %v805_v57 = vld [vmem:[#allocation11 + $0x8] sm:$0xff]  }
  0x4c   :  { %688 = vmatpush3.bf16.msra.mxu0 %v777_v10  ;;  %v625_v59 = vld [vmem:[%s1092_s6] ss:$0 sm:$0xff]  ;;  %s590_s6 = sshll.u32 %s947_s18, 4  ;;  %s591_s6 = int_to_ptr.vmem [resolvable:$true] %s590_s6 }
  0x4d   :  { %689 = vmatprep.subr.bf16.mxu0 %v944_v0  ;;  %708 = vmatpush3.bf16.msra.mxu1 %v786_v15  ;;  %s907_s19 = scalar_lea.vmem %s591_s6, 256  ;;  %p912_p12 = scmp.lt.s32.totalorder %s591_s6, %s591_s6 }
  0x4e   :  { %709 = vmatprep.subr.bf16.mxu1 %v944_v0  ;;  %p908_p11 = scmp.ne.s32.totalorder %s591_s6, %s907_s19  ;;  %p913_p13 = scmp.lt.s32.totalorder %s907_s19, %s907_s19 }
  0x50   :  { %690 = vmatpush3.bf16.msra.mxu0 %v778_v12  ;;  %p914_p0 = por %p913_p13, %p912_p12 }
  0x51   :  { %691 = vmatprep.subr.bf16.mxu0 %v944_v0  ;;  %710 = vmatpush3.bf16.msra.mxu1 %v787_v17 }
  0x52   :  { %711 = vmatprep.subr.bf16.mxu1 %v944_v0  ;;  %p915_p1 = pnand %p914_p0, %p908_p11 }
  0x54   :  { %692 = vmatpush3.bf16.msra.mxu0 %v779_v14 }
  0x55   :  { %693 = vmatprep.subr.bf16.mxu0 %v944_v0  ;;  %712 = vmatpush3.bf16.msra.mxu1 %v788_v20 }
  0x56   :  { %713 = vmatprep.subr.bf16.mxu1 %v944_v0 }
  0x58   :  { %694 = vmatpush3.bf16.msra.mxu0 %v780_v16 }
  0x59   :  { %695 = vmatprep.subr.bf16.mxu0 %v944_v0  ;;  %714 = vmatpush3.bf16.msra.mxu1 %v789_v21 }
  0x5a   :  { %715 = vmatprep.subr.bf16.mxu1 %v944_v0 }
  0x5c   :  { %696 = vmatpush3.bf16.msra.mxu0 %v781_v18 }
  0x5d   :  { %721 = vmatprep.subr.bf16.mxu0 %v944_v0  ;;  %716 = vmatpush3.bf16.msra.mxu1 %v790_v22 }
  0x5e   :  { %741 = vmatprep.subr.bf16.mxu1 %v944_v0 }
  0x5f   :  { %698 = vmatmul.mubr.bf16.vlgmr.msra.gmra.mxu0 %v782_v19 }
  0x60   :  { %737 = vmatprep.mubr.msk.bf16.mxu0 %vm945_vm0, %v944_v0  ;;  %722 = vmatpush3.bf16.msra.mxu0 %v791_v23 }
  0x61   :  { %723 = vmatprep.subr.bf16.mxu0 %v944_v0 }
  0x64   :  { %724 = vmatpush3.bf16.msra.mxu0 %v792_v24 }
  0x65   :  { %725 = vmatprep.subr.bf16.mxu0 %v944_v0 }
  0x68   :  { %726 = vmatpush3.bf16.msra.mxu0 %v793_v25 }
  0x69   :  { %727 = vmatprep.subr.bf16.mxu0 %v944_v0 }
  0x6c   :  { %728 = vmatpush3.bf16.msra.mxu0 %v794_v26 }
  0x6d   :  { %729 = vmatprep.subr.bf16.mxu0 %v944_v0 }
  0x70   :  { %730 = vmatpush3.bf16.msra.mxu0 %v795_v27 }
  0x71   :  { %731 = vmatprep.subr.bf16.mxu0 %v944_v0 }
  0x74   :  { %732 = vmatpush3.bf16.msra.mxu0 %v796_v38 }
  0x75   :  { %733 = vmatprep.subr.bf16.mxu0 %v944_v0 }
  0x78   :  { %734 = vmatpush3.bf16.msra.mxu0 %v797_v39 }
  0x79   :  { %735 = vmatprep.subr.bf16.mxu0 %v944_v0 }
  0x7c   :  { %736 = vmatpush3.bf16.msra.mxu0 %v798_v40 }
 0x11f   :  { %v230_v29 = vpop.f32.mrf.mxu0 }
 0x120   :  { %v231_v31 = vadd.f32 %v606_v28, %v230_v29 }
 0x121   :  { %v699_v30 = vpop.f32.mrf.mxu0 }
 0x122   :  { %v237_v35 = vmax.f32 %v231_v31, 0.0 }
 0x123   :  { %v233_v32 = vpop.f32.mrf.mxu0 }
 0x124   :  { %v234_v33 = vadd.f32 %v606_v28, %v233_v32 }
 0x125   :  { %v700_v34 = vpop.f32.mrf.mxu0 }
 0x126   :  { %v238_v36 = vmax.f32 %v234_v33, 0.0 }
 0x128   :  { %v239_v37 = vpack.c.bf16 %v238_v36, %v237_v35 }
 0x12a   :  { %718 = vmatmul.mubr.bf16.vlgmr.msra.gmra.mxu1 %v239_v37 }
 0x12b   :  { %757 = vmatprep.mubr.msk.bf16.mxu1 %vm945_vm0, %v944_v0  ;;  %742 = vmatpush3.bf16.msra.mxu1 %v799_v41 }
 0x12c   :  { %743 = vmatprep.subr.bf16.mxu1 %v944_v0 }
 0x12f   :  { %744 = vmatpush3.bf16.msra.mxu1 %v800_v42 }
 0x130   :  { %745 = vmatprep.subr.bf16.mxu1 %v944_v0 }
 0x133   :  { %746 = vmatpush3.bf16.msra.mxu1 %v801_v43 }
 0x134   :  { %747 = vmatprep.subr.bf16.mxu1 %v944_v0 }
 0x137   :  { %748 = vmatpush3.bf16.msra.mxu1 %v802_v44 }
 0x138   :  { %749 = vmatprep.subr.bf16.mxu1 %v944_v0 }
 0x13b   :  { %750 = vmatpush3.bf16.msra.mxu1 %v803_v45 }
 0x13c   :  { %751 = vmatprep.subr.bf16.mxu1 %v944_v0 }
 0x13f   :  { %752 = vmatpush3.bf16.msra.mxu1 %v804_v56 }
 0x140   :  { %753 = vmatprep.subr.bf16.mxu1 %v944_v0 }
 0x143   :  { %754 = vmatpush3.bf16.msra.mxu1 %v805_v57 }
 0x144   :  { %755 = vmatprep.subr.bf16.mxu1 %v944_v0  ;;  %v634_v0 = vld [vmem:[%s1094_s8] ss:$0 sm:$0xff] }
 0x147   :  { %756 = vmatpush3.bf16.msra.mxu1 %v806_v58 }
 0x1ea   :  { %v345_v47 = vpop.f32.mrf.mxu1 }
 0x1eb   :  { %v346_v49 = vadd.f32 %v616_v46, %v345_v47 }
 0x1ec   :  { %v719_v48 = vpop.f32.mrf.mxu1 }
 0x1ed   :  { %v352_v53 = vmax.f32 %v346_v49, 0.0 }
 0x1ee   :  { %v348_v50 = vpop.f32.mrf.mxu1 }
 0x1ef   :  { %v349_v51 = vadd.f32 %v616_v46, %v348_v50 }
 0x1f0   :  { %v720_v52 = vpop.f32.mrf.mxu1 }
 0x1f1   :  { %v353_v54 = vmax.f32 %v349_v51, 0.0 }
 0x1f3   :  { %v354_v55 = vpack.c.bf16 %v353_v54, %v352_v53 }
 0x1f5   :  { %738 = vmatmul.mubr.bf16.vlgmr.msra.gmra.mxu0 %v354_v55 }
 0x2b5   :  { %v460_v60 = vpop.f32.mrf.mxu0 }
 0x2b6   :  { %v461_v62 = vadd.f32 %v625_v59, %v460_v60 }
 0x2b7   :  { %v739_v61 = vpop.f32.mrf.mxu0 }
 0x2b8   :  { %v467_v3 = vmax.f32 %v461_v62, 0.0 }
 0x2b9   :  { %v463_v63 = vpop.f32.mrf.mxu0 }
 0x2ba   :  { %v464_v1 = vadd.f32 %v625_v59, %v463_v63 }
 0x2bb   :  { %v740_v2 = vpop.f32.mrf.mxu0 }
 0x2bc   :  { %v468_v4 = vmax.f32 %v464_v1, 0.0 }
 0x2be   :  { %v469_v5 = vpack.c.bf16 %v468_v4, %v467_v3 }
 0x2c0   :  { %758 = vmatmul.mubr.bf16.vlgmr.msra.gmra.mxu1 %v469_v5 }
 0x380   :  { %v575_v6 = vpop.f32.mrf.mxu1 }
 0x381   :  { %v576_v7 = vadd.f32 %v634_v0, %v575_v6 }
 0x382   :  { %v759_v8 = vpop.f32.mrf.mxu1 }
 0x383   :  { %583 = vst.msk [vmem:[#allocation12] sm:$0xff] %vm582_vm2, %v576_v7 }
 0x384   :  { %v578_v9 = vpop.f32.mrf.mxu1 }
 0x385   :  { %v579_v10 = vadd.f32 %v634_v0, %v578_v9 }
 0x386   :  { %v760_v11 = vpop.f32.mrf.mxu1 }
 0x387   :  { %584 = vst.msk [vmem:[#allocation12 + $0x8] sm:$0xff] %vm582_vm2, %v579_v10 }
 0x388   :  { %918 = shalt.err (!%p915_p1)
}
 0x389   :  { %596 = dma.vmem_to_hbm [thread:$0]  %s591_s6, 256, %s1095_s9, [#allocation5], %s940_s23, %s940_s23, %s941_s24  }
 0x38a   :  { %933 = dma.done.wait [#allocation5], 256  }
 0x38b   :  { %934 = vsyncadd [#allocation5], 4294967040 }
 0x38c   :  { %600 = vsyncpa [#allocation4], 1 }
 0x38d   :  { %601 = vsyncpa [#allocation7], 1 }
 0x38e   :  { %602 = vsyncpa [#allocation10], 1 }
 0x38f   :  { %603 = vsyncpa [#allocation5], 1 }

</bundles_post_ra>
